<compile_context>
chip_gen: v5e
topology: v5e:2x2
jax: 0.10.0
libtpu: 0.0.40
codegen_flags: <defaults>
</compile_context>

<pallas_src>
import functools
import math

import jax
import jax.numpy as jnp
from jax.experimental import pallas as pl
from jax.experimental.pallas import tpu as pltpu

NUM_FEATURES = 32            # the module's (undefined-in-snippet) NUM_FEATURES constant
NUM_HEADS = 4
HEAD_DIM = NUM_FEATURES // NUM_HEADS
BERT_DIM = 768
NUM_LABELS = 3
NUM_ENC_LAYERS = 2
LN_EPS = 1e-5                # PyTorch LayerNorm default eps
VOCAB = 128                  # synthetic vocab for the BERT stand-in embedding

OUT_ROWS, OUT_COLS = 8, 128  # lane/sublane-dense kernel output tile

# ---- packed weight-slab layout (bf16, shape (W_ROWS, W_COLS)); every block
# ---- starts on a 128-lane boundary so all column slices are vreg-aligned ----
_F = NUM_FEATURES
_L = NUM_ENC_LAYERS
WB = 128
W_COL_Q = 0 * WB             # (F, F)    cross-attn Wq
W_COL_K = 1 * WB             # (F, F)    cross-attn Wk
W_COL_V = 2 * WB             # (F, F)    cross-attn Wv
W_COL_O = 3 * WB             # (F, F)    cross-attn out_proj Wo
W_COL_SA = 4 * WB            # (F, F)*L  folded self-attn  I + Wv@Wo
W_COL_FF1 = 6 * WB           # (F, 2F)*L FFN linear1
W_COL_FF2 = 8 * WB           # (2F, F)*L FFN linear2
W_COL_CLF = 10 * WB          # (F, 128)  classifier (zero-padded cols)
W_COLS = 11 * WB
W_ROWS = 2 * _F              # max contraction dim (FF2)

# ---- packed bias / LayerNorm / selector slab (f32, shape (B_ROWS, 128)) ----
B_ROW_BQ = 0                 # [0:F]   cross-attn query bias (key bias dropped: exact)
B_ROW_BO = 1                 # [0:F]   cross-attn out bias, bv folded:  bv@Wo + bo
B_ROW_BSA = 2                # +l      folded self-attn bias  bv@Wo + bo
B_ROW_LN1G = 4               # +l
B_ROW_LN1B = 6               # +l
B_ROW_FF1B = 8               # +l      [0:2F]
B_ROW_FF2B = 10              # +l
B_ROW_LN2G = 12              # +l
B_ROW_LN2B = 14              # +l
B_ROW_CLFB = 16              # [0:128] classifier bias (zero padded)
B_ROW_SEL = 24               # (F, H)   0/1 head selector  sel[f,h] = (f//Dh == h)
B_ROW_SELT = 56              # (H, F)   its transpose
B_ROW_SEG = 64               # (8, B*S) 0/1 segment selector (rows >= B are zero)
B_ROWS = 72


def _layernorm(x, gamma, beta):
    mean = jnp.mean(x, axis=-1, keepdims=True)
    var = jnp.mean(jnp.square(x - mean), axis=-1, keepdims=True)
    return (x - mean) * jax.lax.rsqrt(var + LN_EPS) * gamma + beta


def stock_predictor_kernel(x_ref, w_ref, b_ref, out_ref, *, batch, seq):
    F, H, Dh, L = NUM_FEATURES, NUM_HEADS, HEAD_DIM, NUM_ENC_LAYERS
    B, S = batch, seq
    BS = B * S
    bf16, f32 = jnp.bfloat16, jnp.float32
    scale = 1.0 / math.sqrt(Dh)

    # x rows [0:BS)   = projected BERT query, replicated once per key row
    #   rows [BS:2BS) = financial feature rows
    x_all = x_ref[...]                                            # (2*BS, F) bf16

    # ---- ONE fused Q/K/V projection; Q/K/V land in separate 128-lane blocks ----
    w_qkv = w_ref[0:F, W_COL_Q:W_COL_V + WB]                      # (F, 3*128) bf16
    qkv = jnp.dot(x_all, w_qkv, preferred_element_type=f32)       # (2*BS, 384) f32

    bq = b_ref[B_ROW_BQ:B_ROW_BQ + 1, 0:F]                        # (1, F)
    Qe = qkv[0:BS, 0:F] + bq                                      # (BS, F) query, per-row
    K = qkv[BS:2 * BS, WB:WB + F]                                 # (BS, F) key bias dropped (exact)
    V = qkv[BS:2 * BS, 2 * WB:2 * WB + F]                         # (BS, F) value bias folded into bo

    # ---- per-head scores: exact f32 head-sum via 0/1 selector matmul ----
    sel = b_ref[B_ROW_SEL:B_ROW_SEL + F, 0:H]                     # (F, H) f32
    scores = jnp.dot(Qe * K, sel, preferred_element_type=f32) * scale   # (BS, H) f32

    # ---- segment softmax over the S keys of each batch element (8-row, sublane-aligned) ----
    sc3 = scores.reshape(B, S, H)
    sc3 = sc3 - jnp.max(sc3, axis=1, keepdims=True)
    p3 = jnp.exp(sc3)
    p3 = p3 / jnp.sum(p3, axis=1, keepdims=True)
    p = p3.reshape(BS, H)                                         # (BS, H) f32

    # ---- expand head probs to feature lanes, weight V, segment-reduce (padded to 8 rows) ----
    sel_t = b_ref[B_ROW_SELT:B_ROW_SELT + H, 0:F]                 # (H, F) f32
    p_full = jnp.dot(p, sel_t, preferred_element_type=f32)        # (BS, F) f32
    seg = b_ref[B_ROW_SEG:B_ROW_SEG + OUT_ROWS, 0:BS]             # (8, BS) f32 0/1
    ctx = jnp.dot(seg, p_full * V, preferred_element_type=f32)    # (8, F); rows >= B are zero

    w_o = w_ref[0:F, W_COL_O:W_COL_O + F]                         # (F, F) bf16
    b_o = b_ref[B_ROW_BO:B_ROW_BO + 1, 0:F]                       # bv@Wo + bo (folded)
    x = jnp.dot(ctx.astype(bf16), w_o, preferred_element_type=f32) + b_o   # (8, F) f32

    # ---- 2-layer TransformerEncoder (post-norm, relu FFN, eval-mode dropout) ----
    # Length-1 self-attention + residual are pre-folded into W_sa' = I + Wv@Wo (exact).
    for l in range(L):
        w_sa = w_ref[0:F, W_COL_SA + l * WB:W_COL_SA + l * WB + F]
        ff1w = w_ref[0:F, W_COL_FF1 + l * WB:W_COL_FF1 + l * WB + 2 * F]
        ff2w = w_ref[0:2 * F, W_COL_FF2 + l * WB:W_COL_FF2 + l * WB + F]
        b_sa = b_ref[B_ROW_BSA + l:B_ROW_BSA + l + 1, 0:F]
        ln1g = b_ref[B_ROW_LN1G + l:B_ROW_LN1G + l + 1, 0:F]
        ln1b = b_ref[B_ROW_LN1B + l:B_ROW_LN1B + l + 1, 0:F]
        ff1b = b_ref[B_ROW_FF1B + l:B_ROW_FF1B + l + 1, 0:2 * F]
        ff2b = b_ref[B_ROW_FF2B + l:B_ROW_FF2B + l + 1, 0:F]
        ln2g = b_ref[B_ROW_LN2G + l:B_ROW_LN2G + l + 1, 0:F]
        ln2b = b_ref[B_ROW_LN2B + l:B_ROW_LN2B + l + 1, 0:F]

        sa = jnp.dot(x.astype(bf16), w_sa, preferred_element_type=f32) + b_sa
        x = _layernorm(sa, ln1g, ln1b)                            # residual already in W_sa'
        hdn = jnp.maximum(
            jnp.dot(x.astype(bf16), ff1w, preferred_element_type=f32) + ff1b, 0.0)
        ff = jnp.dot(hdn.astype(bf16), ff2w, preferred_element_type=f32) + ff2b
        x = _layernorm(x + ff, ln2g, ln2b)

    # ---- classifier on the CLS (only) token; full (8, 128) unmasked store ----
    clf_w = w_ref[0:F, W_COL_CLF:W_COL_CLF + OUT_COLS]            # (F, 128) bf16
    clf_b = b_ref[B_ROW_CLFB:B_ROW_CLFB + 1, 0:OUT_COLS]          # (1, 128) f32
    out_ref[...] = jnp.dot(x.astype(bf16), clf_w,
                           preferred_element_type=f32) + clf_b


def init_params(key):
    F = NUM_FEATURES
    ks = jax.random.split(key, 9)

    def w(k, shape):
        return jax.random.normal(k, shape, jnp.float32) * 0.02

    return dict(
        bert_emb=w(ks[0], (VOCAB, BERT_DIM)),
        wp=w(ks[1], (BERT_DIM, F)),
        bp=jnp.zeros((1, F), jnp.float32),
        ca_win=w(ks[2], (F, 3 * F)),
        ca_bin=jnp.zeros((1, 3 * F), jnp.float32),
        ca_wo=w(ks[3], (F, F)),
        ca_bo=jnp.zeros((1, F), jnp.float32),
        enc_win=w(ks[4], (NUM_ENC_LAYERS, F, 3 * F)),
        enc_bin=jnp.zeros((NUM_ENC_LAYERS, 1, 3 * F), jnp.float32),
        enc_wo=w(ks[5], (NUM_ENC_LAYERS, F, F)),
        enc_bo=jnp.zeros((NUM_ENC_LAYERS, 1, F), jnp.float32),
        enc_ln1g=jnp.ones((NUM_ENC_LAYERS, 1, F), jnp.float32),
        enc_ln1b=jnp.zeros((NUM_ENC_LAYERS, 1, F), jnp.float32),
        enc_ff1w=w(ks[6], (NUM_ENC_LAYERS, F, 2 * F)),
        enc_ff1b=jnp.zeros((NUM_ENC_LAYERS, 1, 2 * F), jnp.float32),
        enc_ff2w=w(ks[7], (NUM_ENC_LAYERS, 2 * F, F)),
        enc_ff2b=jnp.zeros((NUM_ENC_LAYERS, 1, F), jnp.float32),
        enc_ln2g=jnp.ones((NUM_ENC_LAYERS, 1, F), jnp.float32),
        enc_ln2b=jnp.zeros((NUM_ENC_LAYERS, 1, F), jnp.float32),
        clf_w=w(ks[8], (F, NUM_LABELS)),
        clf_b=jnp.zeros((1, NUM_LABELS), jnp.float32),
    )


def pack_params(params, *, batch, seq):
    """Pack weights/biases/selectors into two slabs ONCE at init (outside jit).

    Exact algebraic folds applied here:
      * cross-attn key bias dropped (softmax over keys is shift-invariant),
      * cross-attn value bias folded into out-proj bias  bo' = bv@Wo + bo,
      * length-1 encoder self-attention + residual folded: W_sa' = I + Wv@Wo,
        b_sa' = bv@Wo + bo.
    """
    F, H, Dh, L = NUM_FEATURES, NUM_HEADS, HEAD_DIM, NUM_ENC_LAYERS
    B, S = batch, seq
    assert B <= OUT_ROWS and B * S <= 128

    wq = params["ca_win"][:, 0:F]
    wk = params["ca_win"][:, F:2 * F]
    wv = params["ca_win"][:, 2 * F:3 * F]
    bq = params["ca_bin"][0, 0:F]
    bv = params["ca_bin"][0, 2 * F:3 * F]
    wo = params["ca_wo"]
    bo_fold = bv @ wo + params["ca_bo"][0]

    enc_wv = params["enc_win"][:, :, 2 * F:3 * F]                       # (L, F, F)
    enc_bv = params["enc_bin"][:, 0, 2 * F:3 * F]                       # (L, F)
    w_sa = jnp.eye(F, dtype=jnp.float32)[None] + jnp.einsum(
        "lij,ljk->lik", enc_wv, params["enc_wo"])                       # (L, F, F)
    b_sa = jnp.einsum("li,lik->lk", enc_bv, params["enc_wo"]) + params["enc_bo"][:, 0]

    w_slab = jnp.zeros((W_ROWS, W_COLS), jnp.float32)
    w_slab = w_slab.at[0:F, W_COL_Q:W_COL_Q + F].set(wq)
    w_slab = w_slab.at[0:F, W_COL_K:W_COL_K + F].set(wk)
    w_slab = w_slab.at[0:F, W_COL_V:W_COL_V + F].set(wv)
    w_slab = w_slab.at[0:F, W_COL_O:W_COL_O + F].set(wo)
    for l in range(L):
        w_slab = w_slab.at[0:F, W_COL_SA + l * WB:W_COL_SA + l * WB + F].set(w_sa[l])
        w_slab = w_slab.at[0:F, W_COL_FF1 + l * WB:W_COL_FF1 + l * WB + 2 * F].set(
            params["enc_ff1w"][l])
        w_slab = w_slab.at[0:2 * F, W_COL_FF2 + l * WB:W_COL_FF2 + l * WB + F].set(
            params["enc_ff2w"][l])
    w_slab = w_slab.at[0:F, W_COL_CLF:W_COL_CLF + NUM_LABELS].set(params["clf_w"])
    w_slab = w_slab.astype(jnp.bfloat16)

    b_slab = jnp.zeros((B_ROWS, 128), jnp.float32)
    b_slab = b_slab.at[B_ROW_BQ, :F].set(bq)
    b_slab = b_slab.at[B_ROW_BO, :F].set(bo_fold)
    for l in range(L):
        b_slab = b_slab.at[B_ROW_BSA + l, :F].set(b_sa[l])
        b_slab = b_slab.at[B_ROW_LN1G + l, :F].set(params["enc_ln1g"][l, 0])
        b_slab = b_slab.at[B_ROW_LN1B + l, :F].set(params["enc_ln1b"][l, 0])
        b_slab = b_slab.at[B_ROW_FF1B + l, :2 * F].set(params["enc_ff1b"][l, 0])
        b_slab = b_slab.at[B_ROW_FF2B + l, :F].set(params["enc_ff2b"][l, 0])
        b_slab = b_slab.at[B_ROW_LN2G + l, :F].set(params["enc_ln2g"][l, 0])
        b_slab = b_slab.at[B_ROW_LN2B + l, :F].set(params["enc_ln2b"][l, 0])
    b_slab = b_slab.at[B_ROW_CLFB, :NUM_LABELS].set(params["clf_b"][0])

    # 0/1 selectors (f32, exact): head selector, its transpose, segment reducer.
    f_idx = jnp.arange(F)
    h_idx = jnp.arange(H)
    sel = (f_idx[:, None] // Dh == h_idx[None, :]).astype(jnp.float32)        # (F, H)
    r_idx = jnp.arange(B * S)
    o_idx = jnp.arange(OUT_ROWS)
    seg = (r_idx[None, :] // S == o_idx[:, None]).astype(jnp.float32)          # (8, B*S)
    b_slab = b_slab.at[B_ROW_SEL:B_ROW_SEL + F, 0:H].set(sel)
    b_slab = b_slab.at[B_ROW_SELT:B_ROW_SELT + H, 0:F].set(sel.T)
    b_slab = b_slab.at[B_ROW_SEG:B_ROW_SEG + OUT_ROWS, 0:B * S].set(seg)

    return dict(w_slab=w_slab, b_slab=b_slab,
                wp=params["wp"], bp=params["bp"], bert_emb=params["bert_emb"])


@jax.jit
def stock_predictor_forward(packed, input_ids, attention_mask, financial_data):
    F = NUM_FEATURES

    # financial_data: (B, NUM_FEATURES, S) -> permute(0, 2, 1) -> (B, S, NUM_FEATURES)
    fin = jnp.transpose(financial_data.astype(jnp.float32), (0, 2, 1))
    B, S = fin.shape[0], fin.shape[1]
    assert B <= OUT_ROWS and B * S <= 128

    # TODO(synk): the frozen pretrained 'bert-base-uncased' backbone cannot be loaded
    # in-script; it is replaced by a deterministic token-embedding table + masked mean
    # pooling producing the (B, 768) CLS vector consumed by the rest of the model.
    emb = packed["bert_emb"][input_ids]                         # (B, L, 768)
    mask = attention_mask.astype(jnp.float32)[..., None]        # (B, L, 1)
    bert_cls = jnp.sum(emb * mask, axis=1) / jnp.maximum(jnp.sum(mask, axis=1), 1.0)

    # bert_projection hoisted out of the Pallas kernel (K=768 matmul fused by XLA).
    q = bert_cls @ packed["wp"] + packed["bp"]                  # (B, F)

    # single bf16 activation slab: query replicated per key row ++ financial rows.
    q_rep = jnp.repeat(q, S, axis=0)                            # (B*S, F)
    x_all = jnp.concatenate([q_rep, fin.reshape(B * S, F)],
                            axis=0).astype(jnp.bfloat16)        # (2*B*S, F)

    kernel = functools.partial(stock_predictor_kernel, batch=B, seq=S)
    vmem = pl.BlockSpec(memory_space=pltpu.MemorySpace.VMEM)
    out_pad = pl.pallas_call(
        kernel,
        out_shape=jax.ShapeDtypeStruct((OUT_ROWS, OUT_COLS), jnp.float32),
        in_specs=[vmem, vmem, vmem],
        out_specs=vmem,
        cost_estimate=pl.CostEstimate(flops=1_050_000, transcendentals=128,
                                      bytes_accessed=224_000),
    )(x_all, packed["w_slab"], packed["b_slab"])
    return out_pad[:B, :NUM_LABELS]


if __name__ == "__main__":
    key = jax.random.PRNGKey(0)
    pkey, k_ids, k_fin = jax.random.split(key, 3)
    params = init_params(pkey)

    B, L_TOK, S = 2, 8, 8
    packed = pack_params(params, batch=B, seq=S)   # pack ONCE, outside jit

    input_ids = jax.random.randint(k_ids, (B, L_TOK), 0, VOCAB, dtype=jnp.int32)
    attention_mask = jnp.ones((B, L_TOK), dtype=jnp.int32)
    financial_data = jax.random.normal(k_fin, (B, NUM_FEATURES, S), dtype=jnp.float32)

    logits = stock_predictor_forward(packed, input_ids, attention_mask, financial_data)
    jax.block_until_ready(logits)
    assert logits.shape == (B, NUM_LABELS) and logits.dtype == jnp.float32
    assert bool(jnp.all(jnp.isfinite(logits)))
    print("KERNEL_OK")
</pallas_src>

<mosaic_0001>
module attributes {stable_mosaic.version = 11 : i64} {
  func.func @stock_predictor_kernel(%arg0: memref<32x32xbf16, #tpu.memory_space<vmem>>, %arg1: memref<64x1408xbf16, #tpu.memory_space<vmem>>, %arg2: memref<72x128xf32, #tpu.memory_space<vmem>>, %arg3: memref<8x128xf32, #tpu.memory_space<vmem>>) attributes {dimension_semantics = [], scalar_prefetch = 0 : i64, scratch_operands = 0 : i64, tpu.core_type = #tpu.core_type<tc>} {
    %c0 = arith.constant 0 : index
    %c0_0 = arith.constant 0 : index
    %0 = vector.load %arg0[%c0, %c0_0] : memref<32x32xbf16, #tpu.memory_space<vmem>>, vector<32x32xbf16>
    %c0_1 = arith.constant 0 : index
    %c0_2 = arith.constant 0 : index
    %1 = vector.load %arg1[%c0_1, %c0_2] : memref<64x1408xbf16, #tpu.memory_space<vmem>>, vector<32x384xbf16>
    %cst = arith.constant dense<0.000000e+00> : vector<32x384xf32>
    %2 = tpu.matmul %0, %1, %cst {dimension_numbers = #tpu.dot_dimension_numbers<[1], [0], [0], [1], [0, 0, 1, 1], [], []>} : vector<32x32xbf16>, vector<32x384xbf16>, vector<32x384xf32> -> vector<32x384xf32>
    %c0_3 = arith.constant 0 : index
    %c0_4 = arith.constant 0 : index
    %3 = vector.load %arg2[%c0_3, %c0_4] : memref<72x128xf32, #tpu.memory_space<vmem>>, vector<1x32xf32>
    %4 = vector.extract_strided_slice %2 {offsets = [0, 0], sizes = [16, 32], strides = [1, 1]} : vector<32x384xf32> to vector<16x32xf32>
    %5 = vector.broadcast %3 : vector<1x32xf32> to vector<16x32xf32>
    %6 = arith.addf %4, %5 : vector<16x32xf32>
    %7 = vector.extract_strided_slice %2 {offsets = [16, 128], sizes = [16, 32], strides = [1, 1]} : vector<32x384xf32> to vector<16x32xf32>
    %8 = vector.extract_strided_slice %2 {offsets = [16, 256], sizes = [16, 32], strides = [1, 1]} : vector<32x384xf32> to vector<16x32xf32>
    %c24 = arith.constant 24 : index
    %c0_5 = arith.constant 0 : index
    %9 = vector.load %arg2[%c24, %c0_5] : memref<72x128xf32, #tpu.memory_space<vmem>>, vector<32x4xf32>
    %10 = arith.mulf %6, %7 : vector<16x32xf32>
    %cst_6 = arith.constant dense<0.000000e+00> : vector<16x4xf32>
    %11 = tpu.matmul %10, %9, %cst_6 {dimension_numbers = #tpu.dot_dimension_numbers<[1], [0], [0], [1], [0, 0, 1, 1], [], []>} : vector<16x32xf32>, vector<32x4xf32>, vector<16x4xf32> -> vector<16x4xf32>
    %cst_7 = arith.constant 0.353553385 : f32
    %12 = vector.broadcast %cst_7 : f32 to vector<16x4xf32>
    %13 = arith.mulf %11, %12 : vector<16x4xf32>
    %14 = vector.shape_cast %13 : vector<16x4xf32> to vector<2x8x4xf32>
    %cst_8 = arith.constant dense<0xFF800000> : vector<2x4xf32>
    %15 = vector.multi_reduction <maximumf>, %14, %cst_8 [1] : vector<2x8x4xf32> to vector<2x4xf32>
    %16 = vector.shape_cast %15 : vector<2x4xf32> to vector<2x1x4xf32>
    %17 = vector.broadcast %16 : vector<2x1x4xf32> to vector<2x8x4xf32>
    %18 = arith.subf %14, %17 : vector<2x8x4xf32>
    %19 = math.exp %18 : vector<2x8x4xf32>
    %cst_9 = arith.constant dense<0.000000e+00> : vector<2x4xf32>
    %20 = vector.multi_reduction <add>, %19, %cst_9 [1] : vector<2x8x4xf32> to vector<2x4xf32>
    %21 = vector.shape_cast %20 : vector<2x4xf32> to vector<2x1x4xf32>
    %22 = vector.broadcast %21 : vector<2x1x4xf32> to vector<2x8x4xf32>
    %23 = arith.divf %19, %22 : vector<2x8x4xf32>
    %24 = vector.shape_cast %23 : vector<2x8x4xf32> to vector<16x4xf32>
    %c56 = arith.constant 56 : index
    %c0_10 = arith.constant 0 : index
    %25 = vector.load %arg2[%c56, %c0_10] : memref<72x128xf32, #tpu.memory_space<vmem>>, vector<4x32xf32>
    %cst_11 = arith.constant dense<0.000000e+00> : vector<16x32xf32>
    %26 = tpu.matmul %24, %25, %cst_11 {dimension_numbers = #tpu.dot_dimension_numbers<[1], [0], [0], [1], [0, 0, 1, 1], [], []>} : vector<16x4xf32>, vector<4x32xf32>, vector<16x32xf32> -> vector<16x32xf32>
    %c64 = arith.constant 64 : index
    %c0_12 = arith.constant 0 : index
    %27 = vector.load %arg2[%c64, %c0_12] : memref<72x128xf32, #tpu.memory_space<vmem>>, vector<8x16xf32>
    %28 = arith.mulf %26, %8 : vector<16x32xf32>
    %cst_13 = arith.constant dense<0.000000e+00> : vector<8x32xf32>
    %29 = tpu.matmul %27, %28, %cst_13 {dimension_numbers = #tpu.dot_dimension_numbers<[1], [0], [0], [1], [0, 0, 1, 1], [], []>} : vector<8x16xf32>, vector<16x32xf32>, vector<8x32xf32> -> vector<8x32xf32>
    %c0_14 = arith.constant 0 : index
    %c384 = arith.constant 384 : index
    %30 = vector.load %arg1[%c0_14, %c384] : memref<64x1408xbf16, #tpu.memory_space<vmem>>, vector<32x32xbf16>
    %c1 = arith.constant 1 : index
    %c0_15 = arith.constant 0 : index
    %31 = vector.load %arg2[%c1, %c0_15] : memref<72x128xf32, #tpu.memory_space<vmem>>, vector<1x32xf32>
    %32 = arith.truncf %29 : vector<8x32xf32> to vector<8x32xbf16>
    %cst_16 = arith.constant dense<0.000000e+00> : vector<8x32xf32>
    %33 = tpu.matmul %32, %30, %cst_16 {dimension_numbers = #tpu.dot_dimension_numbers<[1], [0], [0], [1], [0, 0, 1, 1], [], []>} : vector<8x32xbf16>, vector<32x32xbf16>, vector<8x32xf32> -> vector<8x32xf32>
    %34 = vector.broadcast %31 : vector<1x32xf32> to vector<8x32xf32>
    %35 = arith.addf %33, %34 : vector<8x32xf32>
    %c0_17 = arith.constant 0 : index
    %c512 = arith.constant 512 : index
    %36 = vector.load %arg1[%c0_17, %c512] : memref<64x1408xbf16, #tpu.memory_space<vmem>>, vector<32x32xbf16>
    %c0_18 = arith.constant 0 : index
    %c768 = arith.constant 768 : index
    %37 = vector.load %arg1[%c0_18, %c768] : memref<64x1408xbf16, #tpu.memory_space<vmem>>, vector<32x64xbf16>
    %c0_19 = arith.constant 0 : index
    %c1024 = arith.constant 1024 : index
    %38 = vector.load %arg1[%c0_19, %c1024] : memref<64x1408xbf16, #tpu.memory_space<vmem>>, vector<64x32xbf16>
    %c2 = arith.constant 2 : index
    %c0_20 = arith.constant 0 : index
    %39 = vector.load %arg2[%c2, %c0_20] : memref<72x128xf32, #tpu.memory_space<vmem>>, vector<1x32xf32>
    %c4 = arith.constant 4 : index
    %c0_21 = arith.constant 0 : index
    %40 = vector.load %arg2[%c4, %c0_21] : memref<72x128xf32, #tpu.memory_space<vmem>>, vector<1x32xf32>
    %c6 = arith.constant 6 : index
    %c0_22 = arith.constant 0 : index
    %41 = vector.load %arg2[%c6, %c0_22] : memref<72x128xf32, #tpu.memory_space<vmem>>, vector<1x32xf32>
    %c8 = arith.constant 8 : index
    %c0_23 = arith.constant 0 : index
    %42 = vector.load %arg2[%c8, %c0_23] : memref<72x128xf32, #tpu.memory_space<vmem>>, vector<1x64xf32>
    %c10 = arith.constant 10 : index
    %c0_24 = arith.constant 0 : index
    %43 = vector.load %arg2[%c10, %c0_24] : memref<72x128xf32, #tpu.memory_space<vmem>>, vector<1x32xf32>
    %c12 = arith.constant 12 : index
    %c0_25 = arith.constant 0 : index
    %44 = vector.load %arg2[%c12, %c0_25] : memref<72x128xf32, #tpu.memory_space<vmem>>, vector<1x32xf32>
    %c14 = arith.constant 14 : index
    %c0_26 = arith.constant 0 : index
    %45 = vector.load %arg2[%c14, %c0_26] : memref<72x128xf32, #tpu.memory_space<vmem>>, vector<1x32xf32>
    %46 = arith.truncf %35 : vector<8x32xf32> to vector<8x32xbf16>
    %cst_27 = arith.constant dense<0.000000e+00> : vector<8x32xf32>
    %47 = tpu.matmul %46, %36, %cst_27 {dimension_numbers = #tpu.dot_dimension_numbers<[1], [0], [0], [1], [0, 0, 1, 1], [], []>} : vector<8x32xbf16>, vector<32x32xbf16>, vector<8x32xf32> -> vector<8x32xf32>
    %48 = vector.broadcast %39 : vector<1x32xf32> to vector<8x32xf32>
    %49 = arith.addf %47, %48 : vector<8x32xf32>
    %cst_28 = arith.constant dense<0.000000e+00> : vector<8xf32>
    %50 = vector.multi_reduction <add>, %49, %cst_28 [1] : vector<8x32xf32> to vector<8xf32>
    %51 = vector.shape_cast %50 : vector<8xf32> to vector<8x1xf32>
    %cst_29 = arith.constant 3.200000e+01 : f32
    %52 = vector.broadcast %cst_29 : f32 to vector<8x1xf32>
    %53 = arith.divf %51, %52 : vector<8x1xf32>
    %54 = vector.broadcast %53 : vector<8x1xf32> to vector<8x32xf32>
    %55 = arith.subf %49, %54 : vector<8x32xf32>
    %56 = arith.mulf %55, %55 : vector<8x32xf32>
    %cst_30 = arith.constant dense<0.000000e+00> : vector<8xf32>
    %57 = vector.multi_reduction <add>, %56, %cst_30 [1] : vector<8x32xf32> to vector<8xf32>
    %58 = vector.shape_cast %57 : vector<8xf32> to vector<8x1xf32>
    %cst_31 = arith.constant 3.200000e+01 : f32
    %59 = vector.broadcast %cst_31 : f32 to vector<8x1xf32>
    %60 = arith.divf %58, %59 : vector<8x1xf32>
    %61 = vector.broadcast %53 : vector<8x1xf32> to vector<8x32xf32>
    %62 = arith.subf %49, %61 : vector<8x32xf32>
    %cst_32 = arith.constant 9.99999974E-6 : f32
    %63 = vector.broadcast %cst_32 : f32 to vector<8x1xf32>
    %64 = arith.addf %60, %63 : vector<8x1xf32>
    %65 = math.rsqrt %64 : vector<8x1xf32>
    %66 = vector.broadcast %65 : vector<8x1xf32> to vector<8x32xf32>
    %67 = arith.mulf %62, %66 : vector<8x32xf32>
    %68 = vector.broadcast %40 : vector<1x32xf32> to vector<8x32xf32>
    %69 = arith.mulf %67, %68 : vector<8x32xf32>
    %70 = vector.broadcast %41 : vector<1x32xf32> to vector<8x32xf32>
    %71 = arith.addf %69, %70 : vector<8x32xf32>
    %72 = arith.truncf %71 : vector<8x32xf32> to vector<8x32xbf16>
    %cst_33 = arith.constant dense<0.000000e+00> : vector<8x64xf32>
    %73 = tpu.matmul %72, %37, %cst_33 {dimension_numbers = #tpu.dot_dimension_numbers<[1], [0], [0], [1], [0, 0, 1, 1], [], []>} : vector<8x32xbf16>, vector<32x64xbf16>, vector<8x64xf32> -> vector<8x64xf32>
    %74 = vector.broadcast %42 : vector<1x64xf32> to vector<8x64xf32>
    %75 = arith.addf %73, %74 : vector<8x64xf32>
    %cst_34 = arith.constant 0.000000e+00 : f32
    %76 = vector.broadcast %cst_34 : f32 to vector<8x64xf32>
    %77 = arith.maximumf %75, %76 : vector<8x64xf32>
    %78 = arith.truncf %77 : vector<8x64xf32> to vector<8x64xbf16>
    %cst_35 = arith.constant dense<0.000000e+00> : vector<8x32xf32>
    %79 = tpu.matmul %78, %38, %cst_35 {dimension_numbers = #tpu.dot_dimension_numbers<[1], [0], [0], [1], [0, 0, 1, 1], [], []>} : vector<8x64xbf16>, vector<64x32xbf16>, vector<8x32xf32> -> vector<8x32xf32>
    %80 = vector.broadcast %43 : vector<1x32xf32> to vector<8x32xf32>
    %81 = arith.addf %79, %80 : vector<8x32xf32>
    %82 = arith.addf %71, %81 : vector<8x32xf32>
    %cst_36 = arith.constant dense<0.000000e+00> : vector<8xf32>
    %83 = vector.multi_reduction <add>, %82, %cst_36 [1] : vector<8x32xf32> to vector<8xf32>
    %84 = vector.shape_cast %83 : vector<8xf32> to vector<8x1xf32>
    %cst_37 = arith.constant 3.200000e+01 : f32
    %85 = vector.broadcast %cst_37 : f32 to vector<8x1xf32>
    %86 = arith.divf %84, %85 : vector<8x1xf32>
    %87 = vector.broadcast %86 : vector<8x1xf32> to vector<8x32xf32>
    %88 = arith.subf %82, %87 : vector<8x32xf32>
    %89 = arith.mulf %88, %88 : vector<8x32xf32>
    %cst_38 = arith.constant dense<0.000000e+00> : vector<8xf32>
    %90 = vector.multi_reduction <add>, %89, %cst_38 [1] : vector<8x32xf32> to vector<8xf32>
    %91 = vector.shape_cast %90 : vector<8xf32> to vector<8x1xf32>
    %cst_39 = arith.constant 3.200000e+01 : f32
    %92 = vector.broadcast %cst_39 : f32 to vector<8x1xf32>
    %93 = arith.divf %91, %92 : vector<8x1xf32>
    %94 = vector.broadcast %86 : vector<8x1xf32> to vector<8x32xf32>
    %95 = arith.subf %82, %94 : vector<8x32xf32>
    %cst_40 = arith.constant 9.99999974E-6 : f32
    %96 = vector.broadcast %cst_40 : f32 to vector<8x1xf32>
    %97 = arith.addf %93, %96 : vector<8x1xf32>
    %98 = math.rsqrt %97 : vector<8x1xf32>
    %99 = vector.broadcast %98 : vector<8x1xf32> to vector<8x32xf32>
    %100 = arith.mulf %95, %99 : vector<8x32xf32>
    %101 = vector.broadcast %44 : vector<1x32xf32> to vector<8x32xf32>
    %102 = arith.mulf %100, %101 : vector<8x32xf32>
    %103 = vector.broadcast %45 : vector<1x32xf32> to vector<8x32xf32>
    %104 = arith.addf %102, %103 : vector<8x32xf32>
    %c0_41 = arith.constant 0 : index
    %c640 = arith.constant 640 : index
    %105 = vector.load %arg1[%c0_41, %c640] : memref<64x1408xbf16, #tpu.memory_space<vmem>>, vector<32x32xbf16>
    %c0_42 = arith.constant 0 : index
    %c896 = arith.constant 896 : index
    %106 = vector.load %arg1[%c0_42, %c896] : memref<64x1408xbf16, #tpu.memory_space<vmem>>, vector<32x64xbf16>
    %c0_43 = arith.constant 0 : index
    %c1152 = arith.constant 1152 : index
    %107 = vector.load %arg1[%c0_43, %c1152] : memref<64x1408xbf16, #tpu.memory_space<vmem>>, vector<64x32xbf16>
    %c3 = arith.constant 3 : index
    %c0_44 = arith.constant 0 : index
    %108 = vector.load %arg2[%c3, %c0_44] : memref<72x128xf32, #tpu.memory_space<vmem>>, vector<1x32xf32>
    %c5 = arith.constant 5 : index
    %c0_45 = arith.constant 0 : index
    %109 = vector.load %arg2[%c5, %c0_45] : memref<72x128xf32, #tpu.memory_space<vmem>>, vector<1x32xf32>
    %c7 = arith.constant 7 : index
    %c0_46 = arith.constant 0 : index
    %110 = vector.load %arg2[%c7, %c0_46] : memref<72x128xf32, #tpu.memory_space<vmem>>, vector<1x32xf32>
    %c9 = arith.constant 9 : index
    %c0_47 = arith.constant 0 : index
    %111 = vector.load %arg2[%c9, %c0_47] : memref<72x128xf32, #tpu.memory_space<vmem>>, vector<1x64xf32>
    %c11 = arith.constant 11 : index
    %c0_48 = arith.constant 0 : index
    %112 = vector.load %arg2[%c11, %c0_48] : memref<72x128xf32, #tpu.memory_space<vmem>>, vector<1x32xf32>
    %c13 = arith.constant 13 : index
    %c0_49 = arith.constant 0 : index
    %113 = vector.load %arg2[%c13, %c0_49] : memref<72x128xf32, #tpu.memory_space<vmem>>, vector<1x32xf32>
    %c15 = arith.constant 15 : index
    %c0_50 = arith.constant 0 : index
    %114 = vector.load %arg2[%c15, %c0_50] : memref<72x128xf32, #tpu.memory_space<vmem>>, vector<1x32xf32>
    %115 = arith.truncf %104 : vector<8x32xf32> to vector<8x32xbf16>
    %cst_51 = arith.constant dense<0.000000e+00> : vector<8x32xf32>
    %116 = tpu.matmul %115, %105, %cst_51 {dimension_numbers = #tpu.dot_dimension_numbers<[1], [0], [0], [1], [0, 0, 1, 1], [], []>} : vector<8x32xbf16>, vector<32x32xbf16>, vector<8x32xf32> -> vector<8x32xf32>
    %117 = vector.broadcast %108 : vector<1x32xf32> to vector<8x32xf32>
    %118 = arith.addf %116, %117 : vector<8x32xf32>
    %cst_52 = arith.constant dense<0.000000e+00> : vector<8xf32>
    %119 = vector.multi_reduction <add>, %118, %cst_52 [1] : vector<8x32xf32> to vector<8xf32>
    %120 = vector.shape_cast %119 : vector<8xf32> to vector<8x1xf32>
    %cst_53 = arith.constant 3.200000e+01 : f32
    %121 = vector.broadcast %cst_53 : f32 to vector<8x1xf32>
    %122 = arith.divf %120, %121 : vector<8x1xf32>
    %123 = vector.broadcast %122 : vector<8x1xf32> to vector<8x32xf32>
    %124 = arith.subf %118, %123 : vector<8x32xf32>
    %125 = arith.mulf %124, %124 : vector<8x32xf32>
    %cst_54 = arith.constant dense<0.000000e+00> : vector<8xf32>
    %126 = vector.multi_reduction <add>, %125, %cst_54 [1] : vector<8x32xf32> to vector<8xf32>
    %127 = vector.shape_cast %126 : vector<8xf32> to vector<8x1xf32>
    %cst_55 = arith.constant 3.200000e+01 : f32
    %128 = vector.broadcast %cst_55 : f32 to vector<8x1xf32>
    %129 = arith.divf %127, %128 : vector<8x1xf32>
    %130 = vector.broadcast %122 : vector<8x1xf32> to vector<8x32xf32>
    %131 = arith.subf %118, %130 : vector<8x32xf32>
    %cst_56 = arith.constant 9.99999974E-6 : f32
    %132 = vector.broadcast %cst_56 : f32 to vector<8x1xf32>
    %133 = arith.addf %129, %132 : vector<8x1xf32>
    %134 = math.rsqrt %133 : vector<8x1xf32>
    %135 = vector.broadcast %134 : vector<8x1xf32> to vector<8x32xf32>
    %136 = arith.mulf %131, %135 : vector<8x32xf32>
    %137 = vector.broadcast %109 : vector<1x32xf32> to vector<8x32xf32>
    %138 = arith.mulf %136, %137 : vector<8x32xf32>
    %139 = vector.broadcast %110 : vector<1x32xf32> to vector<8x32xf32>
    %140 = arith.addf %138, %139 : vector<8x32xf32>
    %141 = arith.truncf %140 : vector<8x32xf32> to vector<8x32xbf16>
    %cst_57 = arith.constant dense<0.000000e+00> : vector<8x64xf32>
    %142 = tpu.matmul %141, %106, %cst_57 {dimension_numbers = #tpu.dot_dimension_numbers<[1], [0], [0], [1], [0, 0, 1, 1], [], []>} : vector<8x32xbf16>, vector<32x64xbf16>, vector<8x64xf32> -> vector<8x64xf32>
    %143 = vector.broadcast %111 : vector<1x64xf32> to vector<8x64xf32>
    %144 = arith.addf %142, %143 : vector<8x64xf32>
    %cst_58 = arith.constant 0.000000e+00 : f32
    %145 = vector.broadcast %cst_58 : f32 to vector<8x64xf32>
    %146 = arith.maximumf %144, %145 : vector<8x64xf32>
    %147 = arith.truncf %146 : vector<8x64xf32> to vector<8x64xbf16>
    %cst_59 = arith.constant dense<0.000000e+00> : vector<8x32xf32>
    %148 = tpu.matmul %147, %107, %cst_59 {dimension_numbers = #tpu.dot_dimension_numbers<[1], [0], [0], [1], [0, 0, 1, 1], [], []>} : vector<8x64xbf16>, vector<64x32xbf16>, vector<8x32xf32> -> vector<8x32xf32>
    %149 = vector.broadcast %112 : vector<1x32xf32> to vector<8x32xf32>
    %150 = arith.addf %148, %149 : vector<8x32xf32>
    %151 = arith.addf %140, %150 : vector<8x32xf32>
    %cst_60 = arith.constant dense<0.000000e+00> : vector<8xf32>
    %152 = vector.multi_reduction <add>, %151, %cst_60 [1] : vector<8x32xf32> to vector<8xf32>
    %153 = vector.shape_cast %152 : vector<8xf32> to vector<8x1xf32>
    %cst_61 = arith.constant 3.200000e+01 : f32
    %154 = vector.broadcast %cst_61 : f32 to vector<8x1xf32>
    %155 = arith.divf %153, %154 : vector<8x1xf32>
    %156 = vector.broadcast %155 : vector<8x1xf32> to vector<8x32xf32>
    %157 = arith.subf %151, %156 : vector<8x32xf32>
    %158 = arith.mulf %157, %157 : vector<8x32xf32>
    %cst_62 = arith.constant dense<0.000000e+00> : vector<8xf32>
    %159 = vector.multi_reduction <add>, %158, %cst_62 [1] : vector<8x32xf32> to vector<8xf32>
    %160 = vector.shape_cast %159 : vector<8xf32> to vector<8x1xf32>
    %cst_63 = arith.constant 3.200000e+01 : f32
    %161 = vector.broadcast %cst_63 : f32 to vector<8x1xf32>
    %162 = arith.divf %160, %161 : vector<8x1xf32>
    %163 = vector.broadcast %155 : vector<8x1xf32> to vector<8x32xf32>
    %164 = arith.subf %151, %163 : vector<8x32xf32>
    %cst_64 = arith.constant 9.99999974E-6 : f32
    %165 = vector.broadcast %cst_64 : f32 to vector<8x1xf32>
    %166 = arith.addf %162, %165 : vector<8x1xf32>
    %167 = math.rsqrt %166 : vector<8x1xf32>
    %168 = vector.broadcast %167 : vector<8x1xf32> to vector<8x32xf32>
    %169 = arith.mulf %164, %168 : vector<8x32xf32>
    %170 = vector.broadcast %113 : vector<1x32xf32> to vector<8x32xf32>
    %171 = arith.mulf %169, %170 : vector<8x32xf32>
    %172 = vector.broadcast %114 : vector<1x32xf32> to vector<8x32xf32>
    %173 = arith.addf %171, %172 : vector<8x32xf32>
    %c0_65 = arith.constant 0 : index
    %c1280 = arith.constant 1280 : index
    %174 = vector.load %arg1[%c0_65, %c1280] : memref<64x1408xbf16, #tpu.memory_space<vmem>>, vector<32x128xbf16>
    %c16 = arith.constant 16 : index
    %c0_66 = arith.constant 0 : index
    %175 = vector.load %arg2[%c16, %c0_66] : memref<72x128xf32, #tpu.memory_space<vmem>>, vector<1x128xf32>
    %176 = arith.truncf %173 : vector<8x32xf32> to vector<8x32xbf16>
    %cst_67 = arith.constant dense<0.000000e+00> : vector<8x128xf32>
    %177 = tpu.matmul %176, %174, %cst_67 {dimension_numbers = #tpu.dot_dimension_numbers<[1], [0], [0], [1], [0, 0, 1, 1], [], []>} : vector<8x32xbf16>, vector<32x128xbf16>, vector<8x128xf32> -> vector<8x128xf32>
    %178 = vector.broadcast %175 : vector<1x128xf32> to vector<8x128xf32>
    %179 = arith.addf %177, %178 : vector<8x128xf32>
    %c0_68 = arith.constant 0 : index
    %c0_69 = arith.constant 0 : index
    %180 = vector.load %arg3[%c0_68, %c0_69] : memref<8x128xf32, #tpu.memory_space<vmem>>, vector<8x128xf32>
    tpu.vector_store %arg3[%c0_68, %c0_69], %179 {strides = array<i32>} : memref<8x128xf32, #tpu.memory_space<vmem>>, vector<8x128xf32>,
    return
  }
}

</mosaic_0001>

<bundles_post_ra>
// kernel: stock_predictor_forward.1
= control target key start
LH: loop header
LB: loop body
LE: loop exit
PB: predicated region body
PF: predicated region fallthrough
CT: control target
= control target key end

     0   :  { %vm69_vm0 = vcmask 261120   ;;  %vm168_vm1 = vcmask 31744   ;;  %vm240_vm2 = vcmask 1043456   ;;  %vm270_vm11 = vcmask 130048   ;;  %s1226_s1 = inlined_call_operand.vmem [shape: bf16[64,1408], index: 1, kind: input, shape index: {}]   ;;  %s1227_s0 = inlined_call_operand.vmem [shape: bf16[32,32], index: 0, kind: input, shape index: {}]   ;;  %s1228_s2 = inlined_call_operand.vmem [shape: f32[72,128], index: 2, kind: input, shape index: {}]   ;;  %s1229_s3 = inlined_call_operand.vmem [shape: f32[8,128], index: 3, kind: output, shape index: {}]  }
   0x1   :  { %v872_v0 = vld [vmem:[%s1226_s1 + $0x5c] sm:$0xf]  ;;  %v759_v1 = vld [vmem:[%s1226_s1 + $0x84] sm:$0xf0]  ;;  %v869_v2 = vld [vmem:[%s1226_s1 + $0x4] sm:$0xf] }
   0x2   :  { %v762_v3 = vor.u32 %v872_v0, %v759_v1  ;;  %v747_v4 = vld [vmem:[%s1226_s1 + $0x2c] sm:$0xf0]  ;;  %v757_v5 = vld [vmem:[%s1226_s1 + $0x58] sm:$0xf]  ;;  %v873_v6 = vld [vmem:[%s1226_s1 + $0x80] sm:$0xf0] }
   0x3   :  { %v758_v7 = vor.u32 %v873_v6, %v757_v5  ;;  %v745_v8 = vld [vmem:[%s1226_s1] sm:$0xf]  ;;  %v870_v9 = vld [vmem:[%s1226_s1 + $0x28] sm:$0xf0]  ;;  %v750_v10 = vor.u32 %v869_v2, %v747_v4  ;;  %v134_v14 = vld [vmem:[%s1228_s2 + $0x30] sm:$0xff] }
   0x4   :  { %99 = vmatpush.bf16.msra.mxu1 %v762_v3  ;;  %v746_v11 = vor.u32 %v870_v9, %v745_v8  ;;  %v867_v12 = vld [vmem:[%s1227_s0] sm:$0xff]  ;;  %v868_v13 = vld [vmem:[%s1227_s0 + $0x8] sm:$0xff]  ;;  %155 = vmatpush.msra.mxu3 %v134_v14  ;;  %v131_v17 = vld [vmem:[%s1228_s2 + $0x18] sm:$0xff] }
   0x5   :  { %82 = vmatpush.bf16.msra.mxu0 %v758_v7  ;;  %v133_v15 = vld [vmem:[%s1228_s2 + $0x28] sm:$0xff]  ;;  %v132_v16 = vld [vmem:[%s1228_s2 + $0x20] sm:$0xff]  ;;  %v871_v35 = vld [vmem:[%s1226_s1 + $0x30] sm:$0xf0] }
   0x6   :  { %156 = vmatpush.msra.mxu3 %v133_v15  ;;  %v896_v21 = vld [vmem:[%s1228_s2] ss:$0 sm:$0xff]  ;;  %v874_v32 = vld [vmem:[%s1226_s1 + $0x88] sm:$0xf0]  ;;  %v753_v34 = vld [vmem:[%s1226_s1 + $0x8] sm:$0xf] }
   0x7   :  { %v765_v31 = vld [vmem:[%s1226_s1 + $0x60] sm:$0xf]  ;;  %v754_v36 = vor.u32 %v871_v35, %v753_v34  ;;  %v233_v53 = vld [vmem:[%s1228_s2 + $0x38] sm:$0xf] }
   0x8   :  { %100 = vmatpush.bf16.msra.mxu1 %v750_v10  ;;  %157 = vmatpush.msra.mxu3 %v132_v16  ;;  %v766_v33 = vor.u32 %v874_v32, %v765_v31 }
   0x9   :  { %83 = vmatpush.bf16.msra.mxu0 %v746_v11 }
   0xa   :  { %158 = vmatpush.msra.mxu3 %v131_v17  ;;  %116 = vmatpush.bf16.msra.mxu2 %v766_v33 }
   0xb   :  { %769 = vmatmul.msk.bf16.vlgmr.msra.gmra.mxu1 %vm69_vm0, %v867_v12 }
   0xc   :  { %767 = vmatmul.msk.bf16.vlgmr.msra.gmra.mxu0 %vm69_vm0, %v867_v12  ;;  %775 = vmatpush.msk.msrb.mxu3 %vm240_vm2, %v233_v53 }
   0xe   :  { %117 = vmatpush.bf16.msra.mxu2 %v754_v36 }
  0x11   :  { %771 = vmatmul.msk.bf16.vlgmr.msra.gmra.mxu2 %vm69_vm0, %v867_v12 }
  0x1b   :  { %770 = vmatmul.msk.bf16.gmra.mxu1 %vm69_vm0, %v868_v13 }
  0x1c   :  { %768 = vmatmul.msk.bf16.gmra.mxu0 %vm69_vm0, %v868_v13 }
  0x21   :  { %772 = vmatmul.msk.bf16.gmra.mxu2 %vm69_vm0, %v868_v13 }
  0x88   :  { %v102_v18 = vpop.f32.mrf.mxu1 }
  0x89   :  { %v85_v19 = vpop.f32.mrf.mxu0 }
  0x8a   :  { %v129_v23 = vadd.f32 %v896_v21, %v85_v19 }
  0x90   :  { %v103_v20 = vpop.f32.mrf.mxu1 }
  0x91   :  { %v87_v22 = vpop.f32.mrf.mxu0 }
  0x92   :  { %v130_v27 = vadd.f32 %v896_v21, %v87_v22 }
  0x94   :  { %v119_v34 = vpop.f32.mrf.mxu2 }
  0x98   :  { %v105_v24 = vpop.f32.mrf.mxu1 }
  0x99   :  { %v135_v25 = vmul.f32 %v129_v23, %v105_v24  ;;  %v90_v26 = vpop.f32.mrf.mxu0 }
  0x9b   :  { %773 = vmatmul.msk.f32.vlgmr.msra.gmra.mxu3 %vm69_vm0, %v135_v25 }
  0x9c   :  { %v120_v35 = vpop.f32.mrf.mxu2 }
  0xa0   :  { %v107_v28 = vpop.f32.mrf.mxu1 }
  0xa1   :  { %v136_v29 = vmul.f32 %v130_v27, %v107_v28  ;;  %v91_v30 = vpop.f32.mrf.mxu0 }
  0xa3   :  { %774 = vmatmul.msk.f32.gmra.mxu3 %vm69_vm0, %v136_v29 }
  0xa4   :  { %v122_v36 = vpop.f32.mrf.mxu2 }
 0x11e   :  { %v160_v37 = vpop.f32.mrf.mxu3 }
 0x11f   :  { %v166_v38 = vmul.f32 0.35355338, %v160_v37 }
 0x121   :  { %v169_v39 = vsel %vm168_vm1, %v166_v38, -inf }
 0x122   :  { %v170_v40 = vrot.slane %v169_v39, 4 }
 0x124   :  { %v171_v41 = vmax.f32 %v169_v39, %v170_v40  ;;  %v785_v40 = vld [vmem:[%s1226_s1 + $0x64] sm:$0xf] }
 0x126   :  { %v172_v42 = vrot.slane %v171_v41, 2  ;;  %v163_v43 = vpop.f32.mrf.mxu3 }
 0x127   :  { %v167_v44 = vmul.f32 0.35355338, %v163_v43 }
 0x128   :  { %v173_v45 = vmax.f32 %v171_v41, %v172_v42  ;;  %v876_v41 = vld [vmem:[%s1226_s1 + $0x8c] sm:$0xf0] }
 0x129   :  { %v176_v46 = vsel %vm168_vm1, %v167_v44, -inf }
 0x12a   :  { %v174_v47 = vrot.slane %v173_v45, 1  ;;  %v177_v48 = vrot.slane %v176_v46, 4 }
 0x12c   :  { %v175_v49 = vmax.f32 %v173_v45, %v174_v47  ;;  %v178_v50 = vmax.f32 %v176_v46, %v177_v48  ;;  %v786_v45 = vor.u32 %v876_v41, %v785_v40  ;;  %v781_v46 = vld [vmem:[%s1226_s1 + $0xc] sm:$0xf]  ;;  %v875_v47 = vld [vmem:[%s1226_s1 + $0x34] sm:$0xf0] }
 0x12d   :  { %v782_v48 = vor.u32 %v875_v47, %v781_v46  ;;  %v808_v46 = vld [vmem:[%s1226_s1 + $0x20] sm:$0xf]  ;;  %v881_v47 = vld [vmem:[%s1226_s1 + $0x48] sm:$0xf0] }
 0x12e   :  { %v183_v51 = vsub.f32 %v166_v38, %v175_v49  ;;  %v179_v52 = vrot.slane %v178_v50, 2  ;;  %v124_v38 = vpop.f32.mrf.mxu2  ;;  %v794_v49 = vld [vmem:[%s1226_s1 + $0x68] sm:$0xf] }
 0x130   :  { %v185_v54 = vmul.f32 1.442695, %v183_v51  ;;  %v180_v55 = vmax.f32 %v178_v50, %v179_v52  ;;  %v878_v50 = vld [vmem:[%s1226_s1 + $0x90] sm:$0xf0] }
 0x131   :  { %v795_v51 = vor.u32 %v878_v50, %v794_v49  ;;  %v901_v49 = vld [vmem:[%s1228_s2 + $0x8] ss:$0 sm:$0xff] }
 0x132   :  { %913 = vpow2.f32 %v185_v54  ;;  %v181_v56 = vrot.slane %v180_v55, 1  ;;  %v790_v54 = vld [vmem:[%s1226_s1 + $0x10] sm:$0xf] }
 0x133   :  { %375 = vmatpush.bf16.msrb.mxu2 %v795_v51 }
 0x134   :  { %v182_v57 = vmax.f32 %v180_v55, %v181_v56  ;;  %v877_v55 = vld [vmem:[%s1226_s1 + $0x38] sm:$0xf0] }
 0x135   :  { %v791_v56 = vor.u32 %v877_v55, %v790_v54  ;;  %v902_v55 = vld [vmem:[%s1228_s2 + $0xa] ss:$0 sm:$0xff] }
 0x136   :  { %v184_v58 = vsub.f32 %v167_v44, %v182_v57  ;;  %v267_v44 = vld [vmem:[%s1228_s2 + $0x40] sm:$0xff] }
 0x137   :  { %376 = vmatpush.bf16.msrb.mxu2 %v791_v56  ;;  %v897_v57 = vld [vmem:[%s1228_s2 + $0x1] ss:$0 sm:$0xff] }
 0x138   :  { %v914_v59 = vpop.eup %913  ;;  %v187_v60 = vmul.f32 1.442695, %v184_v58 }
 0x139   :  { %v189_v61 = vsel %vm168_vm1, %v914_v59, 0.0 }
 0x13a   :  { %v190_v62 = vrot.slane %v189_v61, 4  ;;  %915 = vpow2.f32 %v187_v60 }
 0x13c   :  { %v191_v63 = vadd.f32 %v190_v62, %v189_v61  ;;  %v898_v62 = vld [vmem:[%s1228_s2 + $0x2] ss:$0 sm:$0xff] }
 0x13e   :  { %v192_v0 = vrot.slane %v191_v63, 2 }
 0x140   :  { %v916_v1 = vpop.eup %915  ;;  %v193_v2 = vadd.f32 %v192_v0, %v191_v63 }
 0x141   :  { %v196_v3 = vsel %vm168_vm1, %v916_v1, 0.0 }
 0x142   :  { %v194_v4 = vrot.slane %v193_v2, 1  ;;  %v197_v5 = vrot.slane %v196_v3, 4 }
 0x144   :  { %v195_v6 = vadd.f32 %v194_v4, %v193_v2  ;;  %v198_v7 = vadd.f32 %v197_v5, %v196_v3  ;;  %v931_v3 = vmov 32.0  }
 0x146   :  { %917 = vrcp.f32 %v195_v6  ;;  %v199_v8 = vrot.slane %v198_v7, 2  ;;  %v214_v15 = vand.u32 2147483648, %v195_v6  ;;  %v212_v17 = vand.u32 2147483647, %v195_v6 }
 0x147   :  { %vm208_vm4 = vweird.f32 %v195_v6 }
 0x148   :  { %v200_v9 = vadd.f32 %v199_v8, %v198_v7  ;;  %v215_v20 = vor.u32 1.1754944e-38, %v214_v15  ;;  %vm213_vm6 = vcmp.eq.f32.partialorder %v212_v17, 8.507059e+37  ;;  %v803_v15 = vld [vmem:[%s1226_s1 + $0x70] sm:$0xf] }
 0x14a   :  { %v201_v10 = vrot.slane %v200_v9, 1 }
 0x14c   :  { %v918_v11 = vpop.eup %917  ;;  %v202_v12 = vadd.f32 %v201_v10, %v200_v9 }
 0x14d   :  { %v204_v13 = vmul.f32 %v918_v11, %v195_v6  ;;  %vm209_vm3 = vweird.f32 %v918_v11 }
 0x14e   :  { %919 = vrcp.f32 %v202_v12  ;;  %vm210_vm5 = vmor %vm208_vm4, %vm209_vm3  ;;  %v229_v26 = vand.u32 2147483648, %v202_v12  ;;  %v227_v28 = vand.u32 2147483647, %v202_v12  ;;  %vm223_vm8 = vweird.f32 %v202_v12 }
 0x14f   :  { %v205_v14 = vsub.f32 1.0, %v204_v13  ;;  %921 = vrcp.f32 %v931_v3  ;;  %v886_v3 = vld [vmem:[%s1226_s1 + $0x94] sm:$0xf0] }
 0x150   :  { %v230_v30 = vor.u32 1.1754944e-38, %v229_v26  ;;  %vm228_vm10 = vcmp.eq.f32.partialorder %v227_v28, 8.507059e+37  ;;  %v883_v26 = vld [vmem:[%s1226_s1 + $0xf8] sm:$0xf0] }
 0x151   :  { %v206_v16 = vmul.f32 %v918_v11, %v205_v14 }
 0x153   :  { %v207_v18 = vadd.f32 %v918_v11, %v206_v16  ;;  %v880_v16 = vld [vmem:[%s1226_s1 + $0x98] sm:$0xf0] }
 0x154   :  { %v920_v19 = vpop.eup %919  ;;  %v804_v17 = vor.u32 %v880_v16, %v803_v15 }
 0x155   :  { %v211_v21 = vsel %vm210_vm5, %v918_v11, %v207_v18  ;;  %v219_v22 = vmul.f32 %v920_v19, %v202_v12  ;;  %vm224_vm7 = vweird.f32 %v920_v19  ;;  %v922_v4 = vpop.eup %921  ;;  %v799_v18 = vld [vmem:[%s1226_s1 + $0x18] sm:$0xf] }
 0x156   :  { %v216_v23 = vsel %vm213_vm6, %v215_v20, %v211_v21  ;;  %vm225_vm9 = vmor %vm223_vm8, %vm224_vm7  ;;  %v386_v5 = vmul.f32 32.0, %v922_v4  ;;  %vm390_vm12 = vweird.f32 %v922_v4  ;;  %438 = vmatpush.bf16.msra.mxu3 %v804_v17  ;;  %v820_v21 = vld [vmem:[%s1226_s1 + $0x128] sm:$0xf] }
 0x157   :  { %v217_v24 = vmul.f32 %v914_v59, %v216_v23  ;;  %v220_v25 = vsub.f32 1.0, %v219_v22  ;;  %v884_v22 = vld [vmem:[%s1226_s1 + $0x150] sm:$0xf0]  ;;  %v816_v23 = vld [vmem:[%s1226_s1 + $0xd0] sm:$0xf] }
 0x158   :  { %v387_v6 = vsub.f32 1.0, %v386_v5  ;;  %v817_v28 = vor.u32 %v883_v26, %v816_v23  ;;  %v825_v5 = vld [vmem:[%s1226_s1 + $0x14] sm:$0xf] }
 0x159   :  { %776 = vmatmul.msk.f32.vlgmr.msrb.gmra.mxu3 %vm168_vm1, %v217_v24  ;;  %v221_v27 = vmul.f32 %v920_v19, %v220_v25  ;;  %v821_v25 = vor.u32 %v884_v22, %v820_v21  ;;  %v904_v21 = vld [vmem:[%s1228_s2 + $0xe] ss:$0 sm:$0xff] }
 0x15a   :  { %v388_v7 = vmul.f32 %v922_v4, %v387_v6  ;;  %v885_v6 = vld [vmem:[%s1226_s1 + $0x3c] sm:$0xf0] }
 0x15b   :  { %v222_v29 = vadd.f32 %v920_v19, %v221_v27  ;;  %480 = vmatpush.bf16.msrb.mxu0 %v821_v25  ;;  %v905_v25 = vld [vmem:[%s1228_s2 + $0x3] ss:$0 sm:$0xff] }
 0x15c   :  { %v389_v8 = vadd.f32 %v922_v4, %v388_v7  ;;  %v826_v7 = vor.u32 %v885_v6, %v825_v5  ;;  %v908_v5 = vld [vmem:[%s1228_s2 + $0x9] ss:$0 sm:$0xff] }
 0x15d   :  { %v226_v31 = vsel %vm225_vm9, %v920_v19, %v222_v29  ;;  %v879_v19 = vld [vmem:[%s1226_s1 + $0x40] sm:$0xf0] }
 0x15e   :  { %v231_v32 = vsel %vm228_vm10, %v230_v30, %v226_v31  ;;  %v1062_v9 = vsel %vm390_vm12, %v922_v4, %v389_v8  ;;  %v800_v20 = vor.u32 %v879_v19, %v799_v18  ;;  %v903_v18 = vld [vmem:[%s1228_s2 + $0xc] ss:$0 sm:$0xff] }
 0x15f   :  { %v232_v33 = vmul.f32 %v916_v1, %v231_v32  ;;  %481 = vmatpush.bf16.msrb.mxu0 %v817_v28 }
 0x160   :  { %439 = vmatpush.bf16.msra.mxu3 %v800_v20 }
 0x161   :  { %777 = vmatmul.msk.f32.gmra.mxu3 %vm168_vm1, %v232_v33  ;;  %vm472_vm1 = vcmask 523264  }
 0x1dc   :  { %v261_v37 = vpop.f32.mrf.mxu3 }
 0x1dd   :  { %v268_v43 = vmul.f32 %v261_v37, %v122_v36  ;;  %v899_v36 = vld [vmem:[%s1228_s2 + $0x4] ss:$0 sm:$0xff] }
 0x1e4   :  { %v264_v39 = vpop.f32.mrf.mxu3 }
 0x1e5   :  { %v269_v42 = vmul.f32 %v264_v39, %v124_v38  ;;  %v900_v38 = vld [vmem:[%s1228_s2 + $0x6] ss:$0 sm:$0xff] }
 0x1e7   :  { %288 = vmatpush.msrb.mxu1 %v269_v42 }
 0x1e9   :  { %289 = vmatpush.msrb.mxu1 %v268_v43  ;;  %v812_v43 = vld [vmem:[%s1226_s1 + $0x78] sm:$0xf] }
 0x1ea   :  { %778 = vmatmul.msk.f32.vlgmr.msrb.gmra.mxu1 %vm270_vm11, %v267_v44  ;;  %v882_v44 = vld [vmem:[%s1226_s1 + $0xa0] sm:$0xf0] }
 0x1eb   :  { %322 = vmatpush.bf16.msra.mxu1 %v786_v45  ;;  %v813_v45 = vor.u32 %v882_v44, %v812_v43  ;;  %v851_v43 = vld [vmem:[%s1226_s1 + $0xd4] sm:$0xf] }
 0x1ed   :  { %482 = vmatpush.bf16.msrb.mxu0 %v813_v45 }
 0x1ef   :  { %323 = vmatpush.bf16.msra.mxu1 %v782_v48  ;;  %v809_v48 = vor.u32 %v881_v47, %v808_v46  ;;  %v891_v46 = vld [vmem:[%s1226_s1 + $0xfc] sm:$0xf0] }
 0x1f1   :  { %483 = vmatpush.bf16.msrb.mxu0 %v809_v48  ;;  %v852_v48 = vor.u32 %v891_v46, %v851_v43 }
 0x267   :  { %v291_v52 = vpop.f32.mrf.mxu1 }
 0x268   :  { %v299_v53 = vpack.c.bf16 %v291_v52, %v291_v52 }
 0x26a   :  { %787 = vmatmul.msk.bf16.vlgmr.msra.gmra.mxu1 %vm69_vm0, %v299_v53 }
 0x2e7   :  { %v325_v58 = vpop.f32.mrf.mxu1 }
 0x2e8   :  { %v326_v59 = vadd.f32 %v897_v57, %v325_v58 }
 0x2ea   :  { %v352_v60 = vpack.c.bf16 %v326_v59, %v326_v59 }
 0x2ec   :  { %796 = vmatmul.msk.bf16.vlgmr.msrb.gmra.mxu2 %vm69_vm0, %v352_v60 }
 0x2ef   :  { %v327_v61 = vpop.f32.mrf.mxu1 }
 0x36f   :  { %v378_v63 = vpop.f32.mrf.mxu2 }
 0x370   :  { %v379_v0 = vadd.f32 %v898_v62, %v378_v63 }
 0x372   :  { %v382_v1 = vsel %vm69_vm0, %v379_v0, 0.0 }
 0x373   :  { %383 = vadd.xlane.f32.xlu0 %v382_v1 }
 0x377   :  { %v380_v2 = vpop.f32.mrf.mxu2 }
 0x378   :  { %v829_v2 = vld [vmem:[%s1226_s1 + $0x6c] sm:$0xf] }
 0x379   :  { %v830_v4 = vor.u32 %v886_v3, %v829_v2  ;;  %v843_v2 = vld [vmem:[%s1226_s1 + $0x24] sm:$0xf]  ;;  %v889_v3 = vld [vmem:[%s1226_s1 + $0x4c] sm:$0xf0] }
 0x37b   :  { %562 = vmatpush.bf16.msrb.mxu1 %v830_v4  ;;  %v844_v4 = vor.u32 %v889_v3, %v843_v2 }
 0x37f   :  { %563 = vmatpush.bf16.msrb.mxu1 %v826_v7 }
 0x3e6   :  { %v384_v10 = vpop.xlane.xlu0 %383 }
 0x3e7   :  { %v392_v11 = vmul.f32 %v1062_v9, %v384_v10 }
 0x3e9   :  { %v393_v12 = vsub.f32 %v379_v0, %v392_v11 }
 0x3eb   :  { %v394_v13 = vmul.f32 %v393_v12, %v393_v12 }
 0x3ed   :  { %v395_v14 = vsel %vm69_vm0, %v394_v13, 0.0 }
 0x3ee   :  { %396 = vadd.xlane.f32.xlu0 %v395_v14 }
 0x461   :  { %v397_v24 = vpop.xlane.xlu0 %396 }
 0x462   :  { %v398_v27 = vmul.f32 %v397_v24, %v1062_v9 }
 0x464   :  { %v399_v29 = vadd.f32 1e-05, %v398_v27 }
 0x466   :  { %923 = vrsqrt.f32 %v399_v29  ;;  %vm406_vm14 = vweird.f32 %v399_v29 }
 0x46c   :  { %v924_v30 = vpop.eup %923 }
 0x46d   :  { %v401_v31 = vmul.f32 %v924_v30, %v399_v29  ;;  %vm407_vm13 = vweird.f32 %v924_v30 }
 0x46e   :  { %vm408_vm15 = vmor %vm406_vm14, %vm407_vm13 }
 0x46f   :  { %v402_v32 = vmul.f32 %v924_v30, %v401_v31 }
 0x471   :  { %v403_v33 = vmul.f32 0.5, %v402_v32 }
 0x473   :  { %v404_v34 = vsub.f32 1.5, %v403_v33 }
 0x475   :  { %v405_v35 = vmul.f32 %v924_v30, %v404_v34 }
 0x477   :  { %v409_v37 = vsel %vm408_vm15, %v924_v30, %v405_v35  ;;  %v838_v35 = vld [vmem:[%s1226_s1 + $0x74] sm:$0xf] }
 0x478   :  { %v410_v39 = vmul.f32 %v409_v37, %v393_v12 }
 0x47a   :  { %v412_v40 = vmul.f32 %v899_v36, %v410_v39  ;;  %v888_v36 = vld [vmem:[%s1226_s1 + $0x9c] sm:$0xf0]  ;;  %v887_v39 = vld [vmem:[%s1226_s1 + $0x44] sm:$0xf0] }
 0x47b   :  { %v839_v37 = vor.u32 %v888_v36, %v838_v35 }
 0x47c   :  { %v414_v41 = vadd.f32 %v900_v38, %v412_v40  ;;  %v834_v38 = vld [vmem:[%s1226_s1 + $0x1c] sm:$0xf] }
 0x47d   :  { %618 = vmatpush.bf16.msra.mxu2 %v839_v37  ;;  %v835_v40 = vor.u32 %v887_v39, %v834_v38  ;;  %v910_v38 = vld [vmem:[%s1228_s2 + $0xd] ss:$0 sm:$0xff] }
 0x47e   :  { %v415_v42 = vpack.c.bf16 %v414_v41, %v414_v41 }
 0x480   :  { %805 = vmatmul.msk.bf16.vlgmr.msra.gmra.mxu3 %vm69_vm0, %v415_v42  ;;  %v892_v42 = vld [vmem:[%s1226_s1 + $0x154] sm:$0xf0] }
 0x481   :  { %619 = vmatpush.bf16.msra.mxu2 %v835_v40 }
 0x503   :  { %v441_v50 = vpop.f32.mrf.mxu3 }
 0x504   :  { %v442_v51 = vadd.f32 %v901_v49, %v441_v50 }
 0x506   :  { %v445_v52 = vmax.f32 %v442_v51, 0.0 }
 0x508   :  { %v446_v53 = vpack.c.bf16 %v445_v52, %v445_v52 }
 0x50a   :  { %822 = vmatmul.msk.bf16.vlgmr.msrb.gmra.mxu0 %vm472_vm1, %v446_v53 }
 0x50b   :  { %v443_v54 = vpop.f32.mrf.mxu3 }
 0x587   :  { %v485_v56 = vpop.f32.mrf.mxu0 }
 0x588   :  { %v486_v57 = vadd.f32 %v902_v55, %v485_v56  ;;  %v906_v56 = vld [vmem:[%s1228_s2 + $0x5] ss:$0 sm:$0xff] }
 0x58a   :  { %v489_v58 = vadd.f32 %v486_v57, %v414_v41  ;;  %v855_v41 = vld [vmem:[%s1226_s1 + $0x12c] sm:$0xf] }
 0x58b   :  { %v856_v45 = vor.u32 %v892_v42, %v855_v41 }
 0x58c   :  { %v490_v59 = vsel %vm69_vm0, %v489_v58, 0.0 }
 0x58d   :  { %491 = vadd.xlane.f32.xlu1 %v490_v59  ;;  %659 = vmatpush.bf16.msrb.mxu3 %v856_v45 }
 0x58f   :  { %v487_v60 = vpop.f32.mrf.mxu0 }
 0x591   :  { %660 = vmatpush.bf16.msrb.mxu3 %v852_v48 }
 0x600   :  { %v492_v61 = vpop.xlane.xlu1 %491 }
 0x601   :  { %v493_v62 = vmul.f32 %v492_v61, %v1062_v9 }
 0x603   :  { %v494_v63 = vsub.f32 %v489_v58, %v493_v62  ;;  %v907_v58 = vld [vmem:[%s1228_s2 + $0x7] ss:$0 sm:$0xff] }
 0x605   :  { %v495_v0 = vmul.f32 %v494_v63, %v494_v63 }
 0x607   :  { %v496_v1 = vsel %vm69_vm0, %v495_v0, 0.0  ;;  %v890_v0 = vld [vmem:[%s1226_s1 + $0xa4] sm:$0xf0] }
 0x608   :  { %497 = vadd.xlane.f32.xlu1 %v496_v1 }
 0x67b   :  { %v498_v8 = vpop.xlane.xlu1 %497 }
 0x67c   :  { %v499_v10 = vmul.f32 %v498_v8, %v1062_v9 }
 0x67e   :  { %v500_v11 = vadd.f32 1e-05, %v499_v10 }
 0x680   :  { %925 = vrsqrt.f32 %v500_v11  ;;  %vm507_vm3 = vweird.f32 %v500_v11 }
 0x686   :  { %v926_v12 = vpop.eup %925 }
 0x687   :  { %v502_v13 = vmul.f32 %v926_v12, %v500_v11  ;;  %vm508_vm2 = vweird.f32 %v926_v12 }
 0x688   :  { %vm509_vm4 = vmor %vm507_vm3, %vm508_vm2 }
 0x689   :  { %v503_v14 = vmul.f32 %v926_v12, %v502_v13 }
 0x68b   :  { %v504_v15 = vmul.f32 0.5, %v503_v14 }
 0x68d   :  { %v505_v16 = vsub.f32 1.5, %v504_v15 }
 0x68f   :  { %v506_v17 = vmul.f32 %v926_v12, %v505_v16 }
 0x691   :  { %v510_v19 = vsel %vm509_vm4, %v926_v12, %v506_v17  ;;  %v909_v12 = vld [vmem:[%s1228_s2 + $0xb] ss:$0 sm:$0xff] }
 0x692   :  { %v511_v20 = vmul.f32 %v510_v19, %v494_v63  ;;  %v847_v63 = vld [vmem:[%s1226_s1 + $0x7c] sm:$0xf] }
 0x693   :  { %v848_v1 = vor.u32 %v890_v0, %v847_v63 }
 0x694   :  { %v513_v22 = vmul.f32 %v903_v18, %v511_v20 }
 0x695   :  { %661 = vmatpush.bf16.msrb.mxu3 %v848_v1 }
 0x696   :  { %v515_v23 = vadd.f32 %v904_v21, %v513_v22 }
 0x698   :  { %v539_v24 = vpack.c.bf16 %v515_v23, %v515_v23  ;;  %v864_v23 = vld [vmem:[%s1226_s1 + $0x80] sm:$0xf] }
 0x699   :  { %662 = vmatpush.bf16.msrb.mxu3 %v844_v4 }
 0x69a   :  { %831 = vmatmul.msk.bf16.vlgmr.msrb.gmra.mxu1 %vm69_vm0, %v539_v24  ;;  %v894_v24 = vld [vmem:[%s1226_s1 + $0xa8] sm:$0xf0] }
 0x717   :  { %v565_v26 = vpop.f32.mrf.mxu1 }
 0x718   :  { %v566_v27 = vadd.f32 %v905_v25, %v565_v26  ;;  %v865_v25 = vor.u32 %v894_v24, %v864_v23  ;;  %v860_v26 = vld [vmem:[%s1226_s1 + $0x28] sm:$0xf] }
 0x71a   :  { %v569_v28 = vsel %vm69_vm0, %v566_v27, 0.0  ;;  %723 = vmatpush.bf16.msra.mxu0 %v865_v25 }
 0x71b   :  { %570 = vadd.xlane.f32.xlu2 %v569_v28 }
 0x71f   :  { %v567_v29 = vpop.f32.mrf.mxu1 }
 0x78e   :  { %v571_v30 = vpop.xlane.xlu2 %570 }
 0x78f   :  { %v572_v31 = vmul.f32 %v571_v30, %v1062_v9 }
 0x791   :  { %v573_v32 = vsub.f32 %v566_v27, %v572_v31  ;;  %v893_v27 = vld [vmem:[%s1226_s1 + $0x50] sm:$0xf0] }
 0x792   :  { %v861_v28 = vor.u32 %v893_v27, %v860_v26 }
 0x793   :  { %v574_v33 = vmul.f32 %v573_v32, %v573_v32 }
 0x794   :  { %724 = vmatpush.bf16.msra.mxu0 %v861_v28 }
 0x795   :  { %v575_v34 = vsel %vm69_vm0, %v574_v33, 0.0 }
 0x796   :  { %576 = vadd.xlane.f32.xlu2 %v575_v34 }
 0x809   :  { %v577_v44 = vpop.xlane.xlu2 %576 }
 0x80a   :  { %v578_v47 = vmul.f32 %v577_v44, %v1062_v9  ;;  %v912_v44 = vld [vmem:[%s1228_s2 + $0x10] ss:$0 sm:$0xff] }
 0x80c   :  { %v579_v49 = vadd.f32 1e-05, %v578_v47 }
 0x80e   :  { %927 = vrsqrt.f32 %v579_v49  ;;  %vm586_vm6 = vweird.f32 %v579_v49 }
 0x814   :  { %v928_v50 = vpop.eup %927 }
 0x815   :  { %v581_v51 = vmul.f32 %v928_v50, %v579_v49  ;;  %vm587_vm5 = vweird.f32 %v928_v50 }
 0x816   :  { %vm588_vm7 = vmor %vm586_vm6, %vm587_vm5 }
 0x817   :  { %v582_v52 = vmul.f32 %v928_v50, %v581_v51 }
 0x819   :  { %v583_v53 = vmul.f32 0.5, %v582_v52 }
 0x81b   :  { %v584_v54 = vsub.f32 1.5, %v583_v53 }
 0x81d   :  { %v585_v55 = vmul.f32 %v928_v50, %v584_v54 }
 0x81f   :  { %v589_v57 = vsel %vm588_vm7, %v928_v50, %v585_v55 }
 0x820   :  { %v590_v59 = vmul.f32 %v589_v57, %v573_v32 }
 0x822   :  { %v592_v60 = vmul.f32 %v906_v56, %v590_v59 }
 0x824   :  { %v594_v61 = vadd.f32 %v907_v58, %v592_v60 }
 0x826   :  { %v595_v62 = vpack.c.bf16 %v594_v61, %v594_v61 }
 0x828   :  { %840 = vmatmul.msk.bf16.vlgmr.msra.gmra.mxu2 %vm69_vm0, %v595_v62 }
 0x8ab   :  { %v621_v6 = vpop.f32.mrf.mxu2 }
 0x8ac   :  { %v622_v7 = vadd.f32 %v908_v5, %v621_v6 }
 0x8ae   :  { %v625_v8 = vmax.f32 %v622_v7, 0.0 }
 0x8b0   :  { %v626_v10 = vpack.c.bf16 %v625_v8, %v625_v8 }
 0x8b2   :  { %857 = vmatmul.msk.bf16.vlgmr.msrb.gmra.mxu3 %vm472_vm1, %v626_v10 }
 0x8b3   :  { %v623_v11 = vpop.f32.mrf.mxu2 }
 0x935   :  { %v664_v13 = vpop.f32.mrf.mxu3 }
 0x936   :  { %v665_v14 = vadd.f32 %v909_v12, %v664_v13 }
 0x938   :  { %v668_v15 = vadd.f32 %v665_v14, %v594_v61 }
 0x93a   :  { %v669_v16 = vsel %vm69_vm0, %v668_v15, 0.0 }
 0x93b   :  { %670 = vadd.xlane.f32.xlu0 %v669_v16 }
 0x93d   :  { %v666_v17 = vpop.f32.mrf.mxu3 }
 0x9ae   :  { %v671_v18 = vpop.xlane.xlu0 %670 }
 0x9af   :  { %v672_v19 = vmul.f32 %v671_v18, %v1062_v9 }
 0x9b1   :  { %v673_v20 = vsub.f32 %v668_v15, %v672_v19 }
 0x9b3   :  { %v674_v21 = vmul.f32 %v673_v20, %v673_v20 }
 0x9b5   :  { %v675_v22 = vsel %vm69_vm0, %v674_v21, 0.0 }
 0x9b6   :  { %676 = vadd.xlane.f32.xlu1 %v675_v22 }
 0xa29   :  { %v677_v29 = vpop.xlane.xlu1 %676 }
 0xa2a   :  { %v678_v30 = vmul.f32 %v677_v29, %v1062_v9  ;;  %v911_v9 = vld [vmem:[%s1228_s2 + $0xf] ss:$0 sm:$0xff] }
 0xa2c   :  { %v679_v31 = vadd.f32 1e-05, %v678_v30 }
 0xa2e   :  { %929 = vrsqrt.f32 %v679_v31  ;;  %vm686_vm9 = vweird.f32 %v679_v31 }
 0xa34   :  { %v930_v32 = vpop.eup %929 }
 0xa35   :  { %v681_v33 = vmul.f32 %v930_v32, %v679_v31  ;;  %vm687_vm8 = vweird.f32 %v930_v32 }
 0xa36   :  { %vm688_vm10 = vmor %vm686_vm9, %vm687_vm8 }
 0xa37   :  { %v682_v34 = vmul.f32 %v930_v32, %v681_v33 }
 0xa39   :  { %v683_v35 = vmul.f32 0.5, %v682_v34 }
 0xa3b   :  { %v684_v36 = vsub.f32 1.5, %v683_v35 }
 0xa3d   :  { %v685_v37 = vmul.f32 %v930_v32, %v684_v36 }
 0xa3f   :  { %v689_v39 = vsel %vm688_vm10, %v930_v32, %v685_v37 }
 0xa40   :  { %v690_v40 = vmul.f32 %v689_v39, %v673_v20 }
 0xa42   :  { %v692_v41 = vmul.f32 %v910_v38, %v690_v40 }
 0xa44   :  { %v694_v42 = vadd.f32 %v911_v9, %v692_v41 }
 0xa46   :  { %v700_v43 = vpack.c.bf16 %v694_v42, %v694_v42 }
 0xa48   :  { %866 = vmatmul.msk.bf16.vlgmr.msra.gmra.mxu0 %vm69_vm0, %v700_v43 }
 0xac5   :  { %v726_v45 = vpop.f32.mrf.mxu0 }
 0xac6   :  { %v727_v46 = vadd.f32 %v912_v44, %v726_v45 }
 0xac8   :  { %730 = vst [vmem:[%s1229_s3] sm:$0xff] %v727_v46 }
 0xacd   :  { %v728_v47 = vpop.f32.mrf.mxu0 }

</bundles_post_ra>
